<compile_context>
chip_gen: v7x
topology: tpu7x:2x2x1
jax: 0.10.0
libtpu: 0.0.40
codegen_flags: <defaults>
</compile_context>

<pallas_src>
import functools

import jax
import jax.numpy as jnp
from jax import lax
from jax.experimental import pallas as pl
from jax.experimental.pallas import tpu as pltpu


# -----------------------------------------------------------------------------
# Kernel
# -----------------------------------------------------------------------------
def _gru_update_kernel(src_x_ref, s_ref, accum_rm_ref, dst_x_ref,
                       wbig_ref, bias_ref, ur_ref,
                       m_ref, z_ref, r_ref, rm_ref, *, hidden_size):
    """One row-tile of the GRU update.

    src_x_ref/s_ref/accum_rm_ref/dst_x_ref : [T, H] activations
    wbig_ref : [4H, 4H] packed weight; row groups = [src_x|s|accum_rm|dst_x],
               column groups = [ z_lin | h_lin | W_r(dst_x) | 0 ]
    bias_ref : [1, 4H]  packed biases [ b_z | b_h | b_ur | 0 ]   (f32)
    ur_ref   : [H, H]   U_r weight, pre-transposed to [in, out]
    m_ref/z_ref/r_ref/rm_ref : [T, H] outputs
    """
    H = hidden_size
    f32 = jnp.float32
    mm_dtype = wbig_ref.dtype
    # f32 weights -> request full-precision MXU passes so the kernel matches a
    # true f32 reference; bf16 operands are already exact single-pass bf16.
    prec = (lax.Precision.HIGHEST if mm_dtype == jnp.float32
            else lax.Precision.DEFAULT)

    def mxu(x, w):
        return jnp.dot(x.astype(mm_dtype), w,
                       preferred_element_type=f32, precision=prec)

    # Fused z / h / r1 linears as an exact block sum over the four activations
    # (identical to concat([src_x, s, accum_rm, dst_x], 1) @ W_big, but with no
    # HBM-side concat and no in-VMEM concat pass).
    lin = mxu(src_x_ref[...], wbig_ref[0:H, :])
    lin = lin + mxu(s_ref[...], wbig_ref[H:2 * H, :])
    lin = lin + mxu(accum_rm_ref[...], wbig_ref[2 * H:3 * H, :])
    lin = lin + mxu(dst_x_ref[...], wbig_ref[3 * H:4 * H, :])
    lin = lin + bias_ref[...]                          # f32 [T, 4H]

    # Gating math in f32 on the VPU/EUP.  `s` is consumed in f32 for the blend
    # so bf16 traffic on the other activations does not degrade m.
    z = jax.nn.sigmoid(lin[:, 0:H])
    m_tilde = jnp.tanh(lin[:, H:2 * H])
    s = s_ref[...].astype(f32)
    m = (1.0 - z) * s + z * m_tilde

    # Dependent path: r = sigmoid(W_r(dst_x) + b_ur + U_r(m)); W_r(dst_x)+b_ur
    # is already sitting in lin[:, 2H:3H].
    r_lin = lin[:, 2 * H:3 * H] + jnp.dot(
        m.astype(ur_ref.dtype), ur_ref[...],
        preferred_element_type=f32, precision=prec)
    r = jax.nn.sigmoid(r_lin)

    # Direct per-output stores: each block DMAs straight into its own [N, H]
    # HBM array; the wrapper never slices / repacks the result.
    m_ref[...] = m.astype(m_ref.dtype)
    z_ref[...] = z.astype(z_ref.dtype)
    r_ref[...] = r.astype(r_ref.dtype)
    rm_ref[...] = (r * m).astype(rm_ref.dtype)


# -----------------------------------------------------------------------------
# One-time parameter preparation (hoisted out of the per-call wrapper)
# -----------------------------------------------------------------------------
def prepare_gru_params(params, dtype=jnp.float32):
    """Build the packed, pre-transposed weight/bias tensors once.

    params uses torch.nn.Linear layout:
      W_z_w [H, 2H], W_z_b [H], W_r_w [H, H],
      U_r_w [H, H],  U_r_b [H], W_h_w [H, 2H], W_h_b [H].
    `dtype` is the HBM / MXU operand dtype for the weights (f32, or bf16 on
    v5e/v6e/v7x for halved weight traffic; accumulation stays f32 either way).
    """
    H = params["W_z_b"].shape[0]
    wz = params["W_z_w"]  # [H, 2H]
    wh = params["W_h_w"]  # [H, 2H]
    wr = params["W_r_w"]  # [H, H]
    ur = params["U_r_w"]  # [H, H]

    # Packed weight: rows are the activation groups, columns the outputs.
    #   rows 0:H   (src_x)    -> z_lin (Wz_x),  h_lin (Wh_x)
    #   rows H:2H  (s)        -> z_lin (Wz_s)
    #   rows 2H:3H (accum_rm) -> h_lin (Wh_rm)
    #   rows 3H:4H (dst_x)    -> r1    (Wr)
    # 4th output column group is zero padding so the MXU result is a full
    # 128-lane tile when H = 32.
    wbig = jnp.zeros((4 * H, 4 * H), jnp.float32)
    wbig = wbig.at[0:H, 0:H].set(wz[:, :H].T)
    wbig = wbig.at[0:H, H:2 * H].set(wh[:, :H].T)
    wbig = wbig.at[H:2 * H, 0:H].set(wz[:, H:].T)
    wbig = wbig.at[2 * H:3 * H, H:2 * H].set(wh[:, H:].T)
    wbig = wbig.at[3 * H:4 * H, 2 * H:3 * H].set(wr.T)

    bias = jnp.zeros((1, 4 * H), jnp.float32)
    bias = bias.at[0, 0:H].set(params["W_z_b"])
    bias = bias.at[0, H:2 * H].set(params["W_h_b"])
    bias = bias.at[0, 2 * H:3 * H].set(params["U_r_b"])

    return {
        "W_big": wbig.astype(dtype),
        "bias": bias,                      # kept f32 (added post-accumulation)
        "U_r": ur.T.astype(dtype),         # [in, out]
        "hidden_size": H,
    }


def _pick_tile_rows(n_rows, per_row_bytes, *, max_tile=4096, vmem_budget=12 << 20):
    """Largest power-of-two row tile (>= 8) that keeps the double-buffered
    in+out blocks within ~12 MiB VMEM (safe vs v7x's 64 MiB physical / 32 MiB
    scoped default) and leaves >= 2 grid steps where possible so both v7x
    TensorCores get work.  Per-step overhead (~0.35 us) is amortized over the
    large tile."""
    tile = max_tile
    while tile > 8 and 2 * tile * per_row_bytes > vmem_budget:
        tile //= 2
    while tile > 8 and pl.cdiv(n_rows, tile) < 2:
        tile //= 2
    return tile


# -----------------------------------------------------------------------------
# Wrapper
# -----------------------------------------------------------------------------
def gru_update(src_x, s, accum_rm, dst_x, prepared, *, tile_rows=None,
               out_dtype=jnp.float32):
    """Pallas implementation of GRUUpdate.forward.

    Activations are passed through to pallas_call untouched (no concat / pad /
    slice HBM round trips).  For reduced HBM traffic on any chip (v5e/v6e/v7x)
    pass bf16 src_x / accum_rm / dst_x, bf16 weights
    (prepare_gru_params(..., jnp.bfloat16)) and out_dtype=jnp.bfloat16; keep
    `s` in f32 if m must not carry bf16 rounding of s.
    Returns {'m','z','r','rm'}, each [N, H] of out_dtype.
    """
    H = prepared["hidden_size"]
    N = src_x.shape[0]

    def nbytes(dt):
        return jnp.dtype(dt).itemsize

    per_row_bytes = H * (nbytes(src_x.dtype) + nbytes(s.dtype)
                         + nbytes(accum_rm.dtype) + nbytes(dst_x.dtype)
                         + 4 * nbytes(out_dtype))

    if tile_rows is None:
        tile_rows = _pick_tile_rows(N, per_row_bytes)
    tile_rows = max(8, (int(tile_rows) // 8) * 8)       # sublane multiple

    # Partial last block (N % tile != 0) is handled by Pallas OOB masking on
    # writeback; no wrapper-side padding copies.
    grid = (pl.cdiv(N, tile_rows),)

    # Explicit VMEM budget derived from the chosen tile (v7x-safe).
    weight_bytes = ((4 * H) * (4 * H) + 4 * H + H * H) * 4
    vmem_limit = int(min(max(4 * tile_rows * per_row_bytes + 4 * weight_bytes,
                             16 << 20),
                         48 << 20))

    act_spec = pl.BlockSpec((tile_rows, H), lambda i: (i, 0))
    out_spec = pl.BlockSpec((tile_rows, H), lambda i: (i, 0))
    out_shape = tuple(jax.ShapeDtypeStruct((N, H), out_dtype) for _ in range(4))

    m, z, r, rm = pl.pallas_call(
        functools.partial(_gru_update_kernel, hidden_size=H),
        grid=grid,
        in_specs=[
            act_spec,                                          # src_x
            act_spec,                                          # s
            act_spec,                                          # accum_rm
            act_spec,                                          # dst_x
            pl.BlockSpec((4 * H, 4 * H), lambda i: (0, 0)),    # W_big (resident)
            pl.BlockSpec((1, 4 * H), lambda i: (0, 0)),        # bias  (resident)
            pl.BlockSpec((H, H), lambda i: (0, 0)),            # U_r   (resident)
        ],
        out_specs=(out_spec, out_spec, out_spec, out_spec),
        out_shape=out_shape,
        compiler_params=pltpu.CompilerParams(
            dimension_semantics=("parallel",),
            vmem_limit_bytes=vmem_limit),
    )(src_x, s, accum_rm, dst_x,
      prepared["W_big"], prepared["bias"], prepared["U_r"])

    return {"m": m, "z": z, "r": r, "rm": rm}


# -----------------------------------------------------------------------------
# Pure-JAX reference (mirrors the PyTorch module)
# -----------------------------------------------------------------------------
def _reference(src_x, s, accum_rm, dst_x, params):
    hp = lax.Precision.HIGHEST

    def linear(x, w, b=None):
        y = jnp.dot(x, w.T, precision=hp)
        return y if b is None else y + b

    z = jax.nn.sigmoid(
        linear(jnp.concatenate([src_x, s], 1), params["W_z_w"], params["W_z_b"]))
    m_t = jnp.tanh(
        linear(jnp.concatenate([src_x, accum_rm], 1), params["W_h_w"], params["W_h_b"]))
    m = (1.0 - z) * s + z * m_t
    r = jax.nn.sigmoid(
        linear(dst_x, params["W_r_w"]) + linear(m, params["U_r_w"], params["U_r_b"]))
    return {"m": m, "z": z, "r": r, "rm": r * m}


if __name__ == "__main__":
    N = 8        # number of nodes (batch)
    H = 32       # hidden_size

    key = jax.random.PRNGKey(0)
    ks = jax.random.split(key, 11)

    # Deterministic synthetic parameters (nn.Linear shapes).
    params = {
        "W_z_w": jax.random.normal(ks[0], (H, 2 * H), jnp.float32) * 0.1,
        "W_z_b": jax.random.normal(ks[1], (H,), jnp.float32) * 0.1,
        "W_r_w": jax.random.normal(ks[2], (H, H), jnp.float32) * 0.1,
        "U_r_w": jax.random.normal(ks[3], (H, H), jnp.float32) * 0.1,
        "U_r_b": jax.random.normal(ks[4], (H,), jnp.float32) * 0.1,
        "W_h_w": jax.random.normal(ks[5], (H, 2 * H), jnp.float32) * 0.1,
        "W_h_b": jax.random.normal(ks[6], (H,), jnp.float32) * 0.1,
    }

    src_x = jax.random.normal(ks[7], (N, H), jnp.float32)
    s = jax.random.normal(ks[8], (N, H), jnp.float32)
    accum_rm = jax.random.normal(ks[9], (N, H), jnp.float32)
    dst_x = jax.random.normal(ks[10], (N, H), jnp.float32)

    ref = _reference(src_x, s, accum_rm, dst_x, params)

    # f32 traffic path.
    prep_f32 = prepare_gru_params(params, jnp.float32)
    out_f32 = gru_update(src_x, s, accum_rm, dst_x, prep_f32)
    jax.block_until_ready(out_f32)
    for k in ("m", "z", "r", "rm"):
        assert jnp.allclose(out_f32[k], ref[k], atol=1e-3, rtol=1e-3), k

    # bf16 traffic path (recommended on v5e/v6e/v7x): bf16 weights + bf16
    # src_x / accum_rm / dst_x + bf16 outputs; s stays f32 so the blend that
    # produces m stays exact.  MXU accumulation and gating remain f32.
    prep_bf16 = prepare_gru_params(params, jnp.bfloat16)
    out_bf16 = gru_update(src_x.astype(jnp.bfloat16), s,
                          accum_rm.astype(jnp.bfloat16),
                          dst_x.astype(jnp.bfloat16),
                          prep_bf16, out_dtype=jnp.bfloat16)
    jax.block_until_ready(out_bf16)
    for k in ("m", "z", "r", "rm"):
        assert jnp.allclose(out_bf16[k].astype(jnp.float32), ref[k],
                            atol=5e-2, rtol=5e-2), k

    print("KERNEL_OK")
</pallas_src>

<mosaic_0001>
module attributes {stable_mosaic.version = 11 : i64} {
  func.func @_gru_update_kernel(%arg0: i32, %arg1: memref<8x32xf32, #tpu.memory_space<vmem>>, %arg2: memref<8x32xf32, #tpu.memory_space<vmem>>, %arg3: memref<8x32xf32, #tpu.memory_space<vmem>>, %arg4: memref<8x32xf32, #tpu.memory_space<vmem>>, %arg5: memref<128x128xf32, #tpu.memory_space<vmem>>, %arg6: memref<1x128xf32, #tpu.memory_space<vmem>>, %arg7: memref<32x32xf32, #tpu.memory_space<vmem>>, %arg8: memref<8x32xf32, #tpu.memory_space<vmem>>, %arg9: memref<8x32xf32, #tpu.memory_space<vmem>>, %arg10: memref<8x32xf32, #tpu.memory_space<vmem>>, %arg11: memref<8x32xf32, #tpu.memory_space<vmem>>) attributes {dimension_semantics = [#tpu.dimension_semantics<parallel>], iteration_bounds = array<i64: 1>, scalar_prefetch = 0 : i64, scratch_operands = 0 : i64, tpu.core_type = #tpu.core_type<tc>, window_params = [{transform_indices = @transform_0, window_bounds = array<i64: 8, 32>}, {transform_indices = @transform_1, window_bounds = array<i64: 8, 32>}, {transform_indices = @transform_2, window_bounds = array<i64: 8, 32>}, {transform_indices = @transform_3, window_bounds = array<i64: 8, 32>}, {pipeline_mode = #tpu.pipeline_mode<synchronous>, transform_indices = @transform_4, window_bounds = array<i64: 128, 128>}, {pipeline_mode = #tpu.pipeline_mode<synchronous>, transform_indices = @transform_5, window_bounds = array<i64: 1, 128>}, {pipeline_mode = #tpu.pipeline_mode<synchronous>, transform_indices = @transform_6, window_bounds = array<i64: 32, 32>}, {transform_indices = @transform_7, window_bounds = array<i64: 8, 32>}, {transform_indices = @transform_8, window_bounds = array<i64: 8, 32>}, {transform_indices = @transform_9, window_bounds = array<i64: 8, 32>}, {transform_indices = @transform_10, window_bounds = array<i64: 8, 32>}]} {
    %c0 = arith.constant 0 : index
    %c0_0 = arith.constant 0 : index
    %0 = vector.load %arg1[%c0, %c0_0] : memref<8x32xf32, #tpu.memory_space<vmem>>, vector<8x32xf32>
    %c0_1 = arith.constant 0 : index
    %c0_2 = arith.constant 0 : index
    %1 = vector.load %arg5[%c0_1, %c0_2] : memref<128x128xf32, #tpu.memory_space<vmem>>, vector<32x128xf32>
    %cst = arith.constant dense<0.000000e+00> : vector<8x128xf32>
    %2 = tpu.matmul %0, %1, %cst {dimension_numbers = #tpu.dot_dimension_numbers<[1], [0], [0], [1], [0, 0, 1, 1], [], []>, precision = #tpu.contract_precision<fp32>} : vector<8x32xf32>, vector<32x128xf32>, vector<8x128xf32> -> vector<8x128xf32>
    %c0_3 = arith.constant 0 : index
    %c0_4 = arith.constant 0 : index
    %3 = vector.load %arg2[%c0_3, %c0_4] : memref<8x32xf32, #tpu.memory_space<vmem>>, vector<8x32xf32>
    %c32 = arith.constant 32 : index
    %c0_5 = arith.constant 0 : index
    %4 = vector.load %arg5[%c32, %c0_5] : memref<128x128xf32, #tpu.memory_space<vmem>>, vector<32x128xf32>
    %cst_6 = arith.constant dense<0.000000e+00> : vector<8x128xf32>
    %5 = tpu.matmul %3, %4, %cst_6 {dimension_numbers = #tpu.dot_dimension_numbers<[1], [0], [0], [1], [0, 0, 1, 1], [], []>, precision = #tpu.contract_precision<fp32>} : vector<8x32xf32>, vector<32x128xf32>, vector<8x128xf32> -> vector<8x128xf32>
    %6 = arith.addf %2, %5 : vector<8x128xf32>
    %c0_7 = arith.constant 0 : index
    %c0_8 = arith.constant 0 : index
    %7 = vector.load %arg3[%c0_7, %c0_8] : memref<8x32xf32, #tpu.memory_space<vmem>>, vector<8x32xf32>
    %c64 = arith.constant 64 : index
    %c0_9 = arith.constant 0 : index
    %8 = vector.load %arg5[%c64, %c0_9] : memref<128x128xf32, #tpu.memory_space<vmem>>, vector<32x128xf32>
    %cst_10 = arith.constant dense<0.000000e+00> : vector<8x128xf32>
    %9 = tpu.matmul %7, %8, %cst_10 {dimension_numbers = #tpu.dot_dimension_numbers<[1], [0], [0], [1], [0, 0, 1, 1], [], []>, precision = #tpu.contract_precision<fp32>} : vector<8x32xf32>, vector<32x128xf32>, vector<8x128xf32> -> vector<8x128xf32>
    %10 = arith.addf %6, %9 : vector<8x128xf32>
    %c0_11 = arith.constant 0 : index
    %c0_12 = arith.constant 0 : index
    %11 = vector.load %arg4[%c0_11, %c0_12] : memref<8x32xf32, #tpu.memory_space<vmem>>, vector<8x32xf32>
    %c96 = arith.constant 96 : index
    %c0_13 = arith.constant 0 : index
    %12 = vector.load %arg5[%c96, %c0_13] : memref<128x128xf32, #tpu.memory_space<vmem>>, vector<32x128xf32>
    %cst_14 = arith.constant dense<0.000000e+00> : vector<8x128xf32>
    %13 = tpu.matmul %11, %12, %cst_14 {dimension_numbers = #tpu.dot_dimension_numbers<[1], [0], [0], [1], [0, 0, 1, 1], [], []>, precision = #tpu.contract_precision<fp32>} : vector<8x32xf32>, vector<32x128xf32>, vector<8x128xf32> -> vector<8x128xf32>
    %14 = arith.addf %10, %13 : vector<8x128xf32>
    %c0_15 = arith.constant 0 : index
    %c0_16 = arith.constant 0 : index
    %15 = vector.load %arg6[%c0_15, %c0_16] : memref<1x128xf32, #tpu.memory_space<vmem>>, vector<1x128xf32>
    %16 = vector.broadcast %15 : vector<1x128xf32> to vector<8x128xf32>
    %17 = arith.addf %14, %16 : vector<8x128xf32>
    %18 = vector.extract_strided_slice %17 {offsets = [0, 0], sizes = [8, 32], strides = [1, 1]} : vector<8x128xf32> to vector<8x32xf32>
    %19 = arith.negf %18 : vector<8x32xf32>
    %20 = math.exp %19 : vector<8x32xf32>
    %cst_17 = arith.constant 1.000000e+00 : f32
    %21 = vector.broadcast %cst_17 : f32 to vector<8x32xf32>
    %22 = arith.addf %21, %20 : vector<8x32xf32>
    %23 = arith.divf %21, %22 : vector<8x32xf32>
    %24 = vector.extract_strided_slice %17 {offsets = [0, 32], sizes = [8, 32], strides = [1, 1]} : vector<8x128xf32> to vector<8x32xf32>
    %25 = math.tanh %24 : vector<8x32xf32>
    %c0_18 = arith.constant 0 : index
    %c0_19 = arith.constant 0 : index
    %26 = vector.load %arg2[%c0_18, %c0_19] : memref<8x32xf32, #tpu.memory_space<vmem>>, vector<8x32xf32>
    %cst_20 = arith.constant 1.000000e+00 : f32
    %27 = vector.broadcast %cst_20 : f32 to vector<8x32xf32>
    %28 = arith.subf %27, %23 : vector<8x32xf32>
    %29 = arith.mulf %28, %26 : vector<8x32xf32>
    %30 = arith.mulf %23, %25 : vector<8x32xf32>
    %31 = arith.addf %29, %30 : vector<8x32xf32>
    %32 = vector.extract_strided_slice %17 {offsets = [0, 64], sizes = [8, 32], strides = [1, 1]} : vector<8x128xf32> to vector<8x32xf32>
    %c0_21 = arith.constant 0 : index
    %c0_22 = arith.constant 0 : index
    %33 = vector.load %arg7[%c0_21, %c0_22] : memref<32x32xf32, #tpu.memory_space<vmem>>, vector<32x32xf32>
    %cst_23 = arith.constant dense<0.000000e+00> : vector<8x32xf32>
    %34 = tpu.matmul %31, %33, %cst_23 {dimension_numbers = #tpu.dot_dimension_numbers<[1], [0], [0], [1], [0, 0, 1, 1], [], []>, precision = #tpu.contract_precision<fp32>} : vector<8x32xf32>, vector<32x32xf32>, vector<8x32xf32> -> vector<8x32xf32>
    %35 = arith.addf %32, %34 : vector<8x32xf32>
    %36 = arith.negf %35 : vector<8x32xf32>
    %37 = math.exp %36 : vector<8x32xf32>
    %cst_24 = arith.constant 1.000000e+00 : f32
    %38 = vector.broadcast %cst_24 : f32 to vector<8x32xf32>
    %39 = arith.addf %38, %37 : vector<8x32xf32>
    %40 = arith.divf %38, %39 : vector<8x32xf32>
    %c0_25 = arith.constant 0 : index
    %c0_26 = arith.constant 0 : index
    %41 = vector.load %arg8[%c0_25, %c0_26] : memref<8x32xf32, #tpu.memory_space<vmem>>, vector<8x32xf32>
    tpu.vector_store %arg8[%c0_25, %c0_26], %31 {strides = array<i32>} : memref<8x32xf32, #tpu.memory_space<vmem>>, vector<8x32xf32>,
    %c0_27 = arith.constant 0 : index
    %c0_28 = arith.constant 0 : index
    %42 = vector.load %arg9[%c0_27, %c0_28] : memref<8x32xf32, #tpu.memory_space<vmem>>, vector<8x32xf32>
    tpu.vector_store %arg9[%c0_27, %c0_28], %23 {strides = array<i32>} : memref<8x32xf32, #tpu.memory_space<vmem>>, vector<8x32xf32>,
    %c0_29 = arith.constant 0 : index
    %c0_30 = arith.constant 0 : index
    %43 = vector.load %arg10[%c0_29, %c0_30] : memref<8x32xf32, #tpu.memory_space<vmem>>, vector<8x32xf32>
    tpu.vector_store %arg10[%c0_29, %c0_30], %40 {strides = array<i32>} : memref<8x32xf32, #tpu.memory_space<vmem>>, vector<8x32xf32>,
    %44 = arith.mulf %40, %31 : vector<8x32xf32>
    %c0_31 = arith.constant 0 : index
    %c0_32 = arith.constant 0 : index
    %45 = vector.load %arg11[%c0_31, %c0_32] : memref<8x32xf32, #tpu.memory_space<vmem>>, vector<8x32xf32>
    tpu.vector_store %arg11[%c0_31, %c0_32], %44 {strides = array<i32>} : memref<8x32xf32, #tpu.memory_space<vmem>>, vector<8x32xf32>,
    return
  }
  func.func @transform_0(%arg0: i32) -> (i32, i32) {
    %c0_i32 = arith.constant 0 : i32
    %c0_i32_0 = arith.constant 0 : i32
    return %arg0, %c0_i32 : i32, i32
  }
  func.func @transform_1(%arg0: i32) -> (i32, i32) {
    %c0_i32 = arith.constant 0 : i32
    %c0_i32_0 = arith.constant 0 : i32
    return %arg0, %c0_i32 : i32, i32
  }
  func.func @transform_2(%arg0: i32) -> (i32, i32) {
    %c0_i32 = arith.constant 0 : i32
    %c0_i32_0 = arith.constant 0 : i32
    return %arg0, %c0_i32 : i32, i32
  }
  func.func @transform_3(%arg0: i32) -> (i32, i32) {
    %c0_i32 = arith.constant 0 : i32
    %c0_i32_0 = arith.constant 0 : i32
    return %arg0, %c0_i32 : i32, i32
  }
  func.func @transform_4(%arg0: i32) -> (i32, i32) {
    %c0_i32 = arith.constant 0 : i32
    %c0_i32_0 = arith.constant 0 : i32
    %c0_i32_1 = arith.constant 0 : i32
    return %c0_i32, %c0_i32_0 : i32, i32
  }
  func.func @transform_5(%arg0: i32) -> (i32, i32) {
    %c0_i32 = arith.constant 0 : i32
    %c0_i32_0 = arith.constant 0 : i32
    %c0_i32_1 = arith.constant 0 : i32
    return %c0_i32, %c0_i32_0 : i32, i32
  }
  func.func @transform_6(%arg0: i32) -> (i32, i32) {
    %c0_i32 = arith.constant 0 : i32
    %c0_i32_0 = arith.constant 0 : i32
    %c0_i32_1 = arith.constant 0 : i32
    return %c0_i32, %c0_i32_0 : i32, i32
  }
  func.func @transform_7(%arg0: i32) -> (i32, i32) {
    %c0_i32 = arith.constant 0 : i32
    %c0_i32_0 = arith.constant 0 : i32
    return %arg0, %c0_i32 : i32, i32
  }
  func.func @transform_8(%arg0: i32) -> (i32, i32) {
    %c0_i32 = arith.constant 0 : i32
    %c0_i32_0 = arith.constant 0 : i32
    return %arg0, %c0_i32 : i32, i32
  }
  func.func @transform_9(%arg0: i32) -> (i32, i32) {
    %c0_i32 = arith.constant 0 : i32
    %c0_i32_0 = arith.constant 0 : i32
    return %arg0, %c0_i32 : i32, i32
  }
  func.func @transform_10(%arg0: i32) -> (i32, i32) {
    %c0_i32 = arith.constant 0 : i32
    %c0_i32_0 = arith.constant 0 : i32
    return %arg0, %c0_i32 : i32, i32
  }
}

</mosaic_0001>

<bundles_post_ra>
// kernel: tpu_custom_call.1
= control target key start
LH: loop header
LB: loop body
LE: loop exit
PB: predicated region body
PF: predicated region fallthrough
CT: control target
= control target key end

     0   :  { %16 = vsyncpa [#allocation3], 0  ;;  %s4105_s0 = inlined_call_operand.hbm [shape: f32[8,32], index: 0, kind: input, shape index: {}]   ;;  %s4106_s1 = inlined_call_operand.hbm [shape: f32[8,32], index: 1, kind: input, shape index: {}]   ;;  %s4107_s2 = inlined_call_operand.hbm [shape: f32[8,32], index: 2, kind: input, shape index: {}]   ;;  %s4108_s3 = inlined_call_operand.vmem [shape: f32[8,32], index: 3, kind: input, shape index: {}]   ;;  %s4109_s4 = inlined_call_operand.hbm [shape: f32[128,128], index: 4, kind: input, shape index: {}]   ;;  %s4110_s5 = inlined_call_operand.vmem [shape: f32[1,128], index: 5, kind: input, shape index: {}]   ;;  %s4111_s6 = inlined_call_operand.hbm [shape: f32[32,32], index: 6, kind: input, shape index: {}]   ;;  %s4112_s7 = inlined_call_operand.hbm [shape: f32[8,32], index: 7, kind: output, shape index: {0}]   ;;  %s4113_s8 = inlined_call_operand.hbm [shape: f32[8,32], index: 8, kind: output, shape index: {1}]   ;;  %s4114_s9 = inlined_call_operand.hbm [shape: f32[8,32], index: 9, kind: output, shape index: {2}]   ;;  %s4115_s10 = inlined_call_operand.hbm [shape: f32[8,32], index: 10, kind: output, shape index: {3}]  }
   0x1   :  { %17 = vsyncpa [#allocation6], 0 }
   0x2   :  { %18 = vsyncpa [#allocation9], 0 }
   0x3   :  { %19 = vsyncpa [#allocation4], 0 }
   0x4   :  { %20 = vsyncpa [#allocation13], 0 }
   0x5   :  { %21 = vsyncpa [#allocation16], 0  ;;  %s3579_s13 = smov [#allocation5]   ;;  %s3580_s15 = smov [#allocation8]  }
   0x6   :  { %s38_s14 = sshll.u32 %s3579_s13, 4  ;;  %s59_s16 = sshll.u32 %s3580_s15, 4  ;;  %s39_s14 = int_to_ptr.vmem [resolvable:$true] %s38_s14  ;;  %s3650_s16 = int_to_ptr.vmem [resolvable:$true] %s59_s16 }
   0x7   :  { %s3369_s19 = scalar_lea.hbm %s4106_s1, 128 }
   0x8   :  { %p3370_p0 = scmp.ne.s32.totalorder %s4106_s1, %s3369_s19  ;;  %p3373_p1 = scmp.lt.u32.totalorder %s3369_s19, %s4106_s1 }
   0xa   :  { %p3375_p2 = pnand %p3373_p1, %p3370_p0 }
   0xc   :  { %3378 = shalt.err (!%p3375_p2)
}
   0xd   :  { %s3379_s24 = scalar_lea.vmem %s39_s14, 128  ;;  %p3384_p4 = scmp.lt.s32.totalorder %s39_s14, %s39_s14 }
   0xe   :  { %p3380_p3 = scmp.ne.s32.totalorder %s39_s14, %s3379_s24  ;;  %p3385_p5 = scmp.lt.s32.totalorder %s3379_s24, %s3379_s24 }
  0x10   :  { %p3386_p6 = por %p3385_p5, %p3384_p4 }
  0x12   :  { %p3387_p7 = pnand %p3386_p6, %p3380_p3 }
  0x14   :  { %3390 = shalt.err (!%p3387_p7)
}
  0x15   :  { %41 = dma.hbm_to_vmem [thread:$0]  %s4106_s1, 128, %s39_s14, [#allocation6]  }
  0x16   :  { %s3391_s29 = scalar_lea.hbm %s4109_s4, 2048 }
  0x17   :  { %p3392_p8 = scmp.ne.s32.totalorder %s4109_s4, %s3391_s29  ;;  %p3395_p9 = scmp.lt.u32.totalorder %s3391_s29, %s4109_s4 }
  0x19   :  { %p3397_p10 = pnand %p3395_p9, %p3392_p8 }
  0x1b   :  { %3400 = shalt.err (!%p3397_p10)
}
  0x1c   :  { %s3401_s15 = scalar_lea.vmem %s3650_s16, 2048  ;;  %p3406_p12 = scmp.lt.s32.totalorder %s3650_s16, %s3650_s16 }
  0x1d   :  { %p3402_p11 = scmp.ne.s32.totalorder %s3650_s16, %s3401_s15  ;;  %p3407_p13 = scmp.lt.s32.totalorder %s3401_s15, %s3401_s15 }
  0x1f   :  { %p3408_p0 = por %p3407_p13, %p3406_p12 }
  0x21   :  { %p3409_p1 = pnand %p3408_p0, %p3402_p11 }
  0x23   :  { %3412 = shalt.err (!%p3409_p1)
}
  0x24   :  { %s3581_s1 = smov 128   ;;  %s3582_s14 = smov 8  }
  0x25   :  { %65 = dma.hbm_to_vmem [thread:$0]  %s4109_s4, 2048, %s3650_s16, [#allocation9], %s3581_s1, %s3581_s1, %s3582_s14  }
  0x26   :  { %s3583_s19 = smov [#allocation2]   ;;  %s3584_s21 = smov [#allocation7]  }
  0x27   :  { %s28_s20 = sshll.u32 %s3583_s19, 4  ;;  %s48_s22 = sshll.u32 %s3584_s21, 4  ;;  %s29_s20 = int_to_ptr.vmem [resolvable:$true] %s28_s20  ;;  %s49_s22 = int_to_ptr.vmem [resolvable:$true] %s48_s22 }
  0x28   :  { %s3413_s25 = scalar_lea.hbm %s4105_s0, 128 }
  0x29   :  { %p3414_p2 = scmp.ne.s32.totalorder %s4105_s0, %s3413_s25  ;;  %p3417_p3 = scmp.lt.u32.totalorder %s3413_s25, %s4105_s0 }
  0x2b   :  { %p3419_p4 = pnand %p3417_p3, %p3414_p2 }
  0x2d   :  { %3422 = shalt.err (!%p3419_p4)
}
  0x2e   :  { %s3423_s4 = scalar_lea.vmem %s29_s20, 128  ;;  %p3428_p6 = scmp.lt.s32.totalorder %s29_s20, %s29_s20 }
  0x2f   :  { %p3424_p5 = scmp.ne.s32.totalorder %s29_s20, %s3423_s4  ;;  %p3429_p7 = scmp.lt.s32.totalorder %s3423_s4, %s3423_s4 }
  0x31   :  { %p3430_p8 = por %p3429_p7, %p3428_p6 }
  0x33   :  { %p3431_p9 = pnand %p3430_p8, %p3424_p5 }
  0x35   :  { %3434 = shalt.err (!%p3431_p9)
}
  0x36   :  { %31 = dma.hbm_to_vmem [thread:$0]  %s4105_s0, 128, %s29_s20, [#allocation3]  }
  0x37   :  { %s3435_s13 = scalar_lea.hbm %s4107_s2, 128 }
  0x38   :  { %p3436_p10 = scmp.ne.s32.totalorder %s4107_s2, %s3435_s13  ;;  %p3439_p11 = scmp.lt.u32.totalorder %s3435_s13, %s4107_s2 }
  0x3a   :  { %p3441_p12 = pnand %p3439_p11, %p3436_p10 }
  0x3c   :  { %3444 = shalt.err (!%p3441_p12)
}
  0x3d   :  { %s3445_s21 = scalar_lea.vmem %s49_s22, 128  ;;  %p3450_p0 = scmp.lt.s32.totalorder %s49_s22, %s49_s22 }
  0x3e   :  { %p3446_p13 = scmp.ne.s32.totalorder %s49_s22, %s3445_s21  ;;  %p3451_p1 = scmp.lt.s32.totalorder %s3445_s21, %s3445_s21 }
  0x40   :  { %p3452_p2 = por %p3451_p1, %p3450_p0 }
  0x42   :  { %p3453_p3 = pnand %p3452_p2, %p3446_p13 }
  0x44   :  { %3456 = shalt.err (!%p3453_p3)
}
  0x45   :  { %51 = dma.hbm_to_vmem [thread:$0]  %s4107_s2, 128, %s49_s22, [#allocation6]  }
  0x46   :  { %s3585_s23 = smov [#allocation10]   ;;  %s3457_s27 = scalar_lea.hbm %s4111_s6, 512 }
  0x47   :  { %s73_s24 = sshll.u32 %s3585_s23, 4  ;;  %p3458_p4 = scmp.ne.s32.totalorder %s4111_s6, %s3457_s27  ;;  %s74_s24 = int_to_ptr.vmem [resolvable:$true] %s73_s24 }
  0x48   :  { %p3461_p5 = scmp.lt.u32.totalorder %s3457_s27, %s4111_s6 }
  0x4a   :  { %p3463_p6 = pnand %p3461_p5, %p3458_p4 }
  0x4c   :  { %3466 = shalt.err (!%p3463_p6)
}
  0x4d   :  { %s3467_s30 = scalar_lea.vmem %s74_s24, 512  ;;  %p3472_p8 = scmp.lt.s32.totalorder %s74_s24, %s74_s24 }
  0x4e   :  { %p3468_p7 = scmp.ne.s32.totalorder %s74_s24, %s3467_s30  ;;  %p3473_p9 = scmp.lt.s32.totalorder %s3467_s30, %s3467_s30 }
  0x50   :  { %p3474_p10 = por %p3473_p9, %p3472_p8 }
  0x52   :  { %p3475_p11 = pnand %p3474_p10, %p3468_p7 }
  0x54   :  { %3478 = shalt.err (!%p3475_p11)
}
  0x55   :  { %79 = dma.hbm_to_vmem [thread:$0]  %s4111_s6, 512, %s74_s24, [#allocation9], %s3581_s1, %s3581_s1, %s3582_s14  }
  0x56   :  { %3567 = dma.done.wait [#allocation3], 128  }
  0x57   :  { %3568 = vsyncadd [#allocation3], 4294967168 }
  0x58   :  { %3569 = dma.done.wait [#allocation6], 256  }
  0x59   :  { %3570 = vsyncadd [#allocation6], 4294967040 }
  0x5a   :  { %3571 = dma.done.wait [#allocation9], 2560  }
  0x5b   :  { %3572 = vsyncadd [#allocation9], 4294964736  ;;  %v3586_v0 = vmov 0.0|0.0   ;;  %vm3587_vm0 = vmmov 0   ;;  %v3588_v1 = vmov 0.0   ;;  %vm105_vm1 = vcmask 261120  }
  0x5c   :  { %3153 = vmatprep.subr.bf16.mxu1 %v3586_v0  ;;  %2831 = vmatprep.mubr.msk.f32.mxu1 %vm3587_vm0, %v3588_v1  ;;  %v101_v2 = vld [vmem:[#allocation8 + $0x20] sm:$0xff]  ;;  %v102_v3 = vld [vmem:[#allocation8 + $0x28] sm:$0xff]  ;;  %v103_v4 = vld [vmem:[#allocation8 + $0x30] sm:$0xff]  ;;  %s3590_s11 = smov 64   ;;  %s3591_s12 = smov [#allocation12]  }
  0x5d   :  { %3189 = vmatprep.subr.bf16.mxu0 %v3586_v0  ;;  %2897 = vmatprep.mubr.msk.f32.mxu0 %vm3587_vm0, %v3588_v1  ;;  %v110_v5 = vand.u32 4294901760, %v101_v2  ;;  %v113_v6 = vand.u32 4294901760, %v102_v3  ;;  %v104_v7 = vld [vmem:[#allocation8 + $0x38] sm:$0xff]  ;;  %v116_v8 = vand.u32 4294901760, %v103_v4  ;;  %v3729_v9 = vld [vmem:[#allocation5] sm:$0xff]  ;;  %v96_v10 = vld [vmem:[#allocation8] sm:$0xff] }
  0x5e   :  { %v119_v11 = vand.u32 4294901760, %v104_v7  ;;  %v107_v12 = vsel %vm105_vm1, %v3729_v9, 0  ;;  %v97_v13 = vld [vmem:[#allocation8 + $0x8] sm:$0xff]  ;;  %v598_v20 = vand.u32 4294901760, %v96_v10  ;;  %v98_v32 = vld [vmem:[#allocation8 + $0x10] sm:$0xff]  ;;  %v99_v33 = vld [vmem:[#allocation8 + $0x18] sm:$0xff] }
  0x5f   :  { %v3733_v14 = vpack.c.bf16 %v113_v6, %v110_v5  ;;  %v3735_v15 = vsub.f32 %v101_v2, %v110_v5  ;;  %v3737_v16 = vsub.f32 %v102_v3, %v113_v6  ;;  %v3739_v17 = vsub.f32 %v103_v4, %v116_v8  ;;  %v95_v36 = vld [vmem:[#allocation2] sm:$0xff]  ;;  %v1082_v58 = vld [vmem:[#allocation7] sm:$0xff]  ;;  %s2628_s13 = sshll.u32 %s3591_s12, 4  ;;  %s3592_s15 = smov [#allocation11]   ;;  %s2629_s13 = int_to_ptr.vmem [resolvable:$true] %s2628_s13 }
  0x60   :  { %v3741_v18 = vsub.f32 %v104_v7, %v119_v11  ;;  %v3743_v19 = vand.u32 4294901760, %v107_v12  ;;  %v601_v21 = vand.u32 4294901760, %v97_v13  ;;  %v3746_v22 = vpack.c.bf16 %v119_v11, %v116_v8  ;;  %v1083_v8 = vld [vmem:[#allocation8 + $0x40] sm:$0xff]  ;;  %s2618_s17 = sshll.u32 %s3592_s15, 4  ;;  %s3479_s18 = scalar_lea.vmem %s2629_s13, 128  ;;  %s2619_s17 = int_to_ptr.vmem [resolvable:$true] %s2618_s17 }
  0x61   :  { %3155 = vmatpush3.bf16.msra.mxu1 %v3733_v14  ;;  %v191_v23 = vand.u32 4294901760, %v3735_v15  ;;  %v198_v24 = vand.u32 4294901760, %v3737_v16  ;;  %v205_v25 = vand.u32 4294901760, %v3739_v17  ;;  %v604_v40 = vand.u32 4294901760, %v98_v32  ;;  %p3480_p12 = scmp.ne.s32.totalorder %s2629_s13, %s3479_s18  ;;  %p3484_p13 = scmp.lt.s32.totalorder %s2629_s13, %s2629_s13 }
  0x62   :  { %3156 = vmatprep.subr.bf16.mxu1 %v3586_v0  ;;  %v3753_v26 = vsub.f32 %v107_v12, %v3743_v19  ;;  %v212_v27 = vand.u32 4294901760, %v3741_v18  ;;  %v3756_v28 = vpack.c.bf16 %v601_v21, %v598_v20  ;;  %v607_v41 = vand.u32 4294901760, %v99_v33  ;;  %p3485_p0 = scmp.lt.s32.totalorder %s3479_s18, %s3479_s18 }
  0x63   :  { %v192_v29 = vsub.f32 %v3735_v15, %v191_v23  ;;  %v199_v30 = vsub.f32 %v3737_v16, %v198_v24  ;;  %v206_v31 = vsub.f32 %v3739_v17, %v205_v25  ;;  %v595_v45 = vsel %vm105_vm1, %v95_v36, 0 }
  0x64   :  { %v180_v34 = vand.u32 4294901760, %v3753_v26  ;;  %v213_v35 = vsub.f32 %v3741_v18, %v212_v27  ;;  %3191 = vmatpush3.bf16.msra.mxu0 %v3756_v28  ;;  %v3779_v47 = vpack.c.bf16 %v607_v41, %v604_v40  ;;  %v3781_v48 = vand.u32 4294901760, %v595_v45  ;;  %p3486_p1 = por %p3485_p0, %p3484_p13 }
  0x65   :  { %3158 = vmatpush3.bf16.msra.mxu1 %v3746_v22  ;;  %v193_v37 = vand.u32 4294901760, %v192_v29  ;;  %v200_v38 = vand.u32 4294901760, %v199_v30  ;;  %3192 = vmatprep.subr.bf16.mxu0 %v3586_v0  ;;  %v207_v43 = vand.u32 4294901760, %v206_v31  ;;  %v3166_v52 = vpack.c.bf16 %v3737_v16, %v3735_v15  ;;  %v1085_v29 = vld [vmem:[#allocation8 + $0x50] sm:$0xff]  ;;  %v1086_v30 = vld [vmem:[#allocation8 + $0x58] sm:$0xff] }
  0x66   :  { %v181_v39 = vsub.f32 %v3753_v26, %v180_v34  ;;  %3159 = vmatprep.subr.bf16.mxu1 %v3586_v0  ;;  %v214_v44 = vand.u32 4294901760, %v213_v35  ;;  %v3787_v50 = vsub.f32 %v595_v45, %v3781_v48  ;;  %v3794_v53 = vsub.f32 %v96_v10, %v598_v20  ;;  %v1084_v10 = vld [vmem:[#allocation8 + $0x48] sm:$0xff]  ;;  %p3487_p2 = pnand %p3486_p1, %p3480_p12 }
  0x67   :  { %v3160_v42 = vpack.c.bf16 %v200_v38, %v193_v37  ;;  %v3796_v54 = vsub.f32 %v97_v13, %v601_v21  ;;  %v3169_v59 = vpack.c.bf16 %v3741_v18, %v3739_v17  ;;  %v3809_v60 = vsub.f32 %v98_v32, %v604_v40  ;;  %v1576_v38 = vld [vmem:[%s4108_s3] sm:$0xff] }
  0x68   :  { %v182_v46 = vand.u32 4294901760, %v181_v39  ;;  %3194 = vmatpush3.bf16.msra.mxu0 %v3779_v47  ;;  %v3163_v49 = vpack.c.bf16 %v214_v44, %v207_v43  ;;  %v668_v51 = vand.u32 4294901760, %v3787_v50  ;;  %v3811_v61 = vsub.f32 %v99_v33, %v607_v41 }
  0x69   :  { %3201 = vmatprep.subr.bf16.mxu0 %v3586_v0  ;;  %v3202_v57 = vpack.c.bf16 %v3796_v54, %v3794_v53  ;;  %v1088_v63 = vsel %vm105_vm1, %v1082_v58, 0  ;;  %v679_v2 = vand.u32 4294901760, %v3794_v53  ;;  %v686_v3 = vand.u32 4294901760, %v3796_v54 }
  0x6a   :  { %2832 = vmatmul.mubr.f32.vlgmr.msra.gmra.mrb[0].mxu1 %v182_v46  ;;  %v669_v55 = vsub.f32 %v3787_v50, %v668_v51  ;;  %v3205_v62 = vpack.c.bf16 %v3811_v61, %v3809_v60  ;;  %v3823_v4 = vand.u32 4294901760, %v1088_v63  ;;  %v693_v6 = vand.u32 4294901760, %v3809_v60 }
  0x6b   :  { %3161 = vmatpush3.bf16.msra.mxu1 %v3160_v42  ;;  %2842 = vmatprep.mubr.msk.f32.mxu1 %vm3587_vm0, %v3588_v1  ;;  %v3214_v5 = vpack.c.bf16 %v686_v3, %v679_v2  ;;  %v700_v7 = vand.u32 4294901760, %v3811_v61  ;;  %v3178_v13 = vpack.c.bf16 %v198_v24, %v191_v23  ;;  %v1091_v20 = vand.u32 4294901760, %v1083_v8 }
  0x6c   :  { %3162 = vmatprep.subr.bf16.mxu1 %v3586_v0  ;;  %v670_v56 = vand.u32 4294901760, %v669_v55  ;;  %v3835_v11 = vsub.f32 %v1088_v63, %v3823_v4  ;;  %v1094_v21 = vand.u32 4294901760, %v1084_v10  ;;  %v3181_v15 = vpack.c.bf16 %v212_v27, %v205_v25 }
  0x6d   :  { %v3217_v12 = vpack.c.bf16 %v700_v7, %v693_v6  ;;  %v1097_v16 = vand.u32 4294901760, %v1085_v29  ;;  %v1100_v23 = vand.u32 4294901760, %v1086_v30  ;;  %v680_v17 = vsub.f32 %v3794_v53, %v679_v2 }
  0x6e   :  { %2898 = vmatmul.mubr.f32.vlgmr.msra.gmra.mrb[0].mxu0 %v670_v56  ;;  %v1161_v31 = vand.u32 4294901760, %v3835_v11  ;;  %v3847_v32 = vpack.c.bf16 %v1094_v21, %v1091_v20  ;;  %v687_v18 = vsub.f32 %v3796_v54, %v686_v3  ;;  %v3871_v25 = vsub.f32 %v1083_v8, %v1091_v20  ;;  %v1577_v56 = vld [vmem:[#allocation8 + $0x60] sm:$0xff] }
  0x6f   :  { %3164 = vmatpush3.bf16.msra.mxu1 %v3163_v49  ;;  %3203 = vmatpush3.bf16.msra.mxu0 %v3202_v57  ;;  %v3873_v27 = vsub.f32 %v1084_v10, %v1094_v21  ;;  %v681_v35 = vand.u32 4294901760, %v680_v17  ;;  %v694_v37 = vsub.f32 %v3809_v60, %v693_v6  ;;  %v701_v39 = vsub.f32 %v3811_v61, %v700_v7  ;;  %v1578_v57 = vld [vmem:[#allocation8 + $0x68] sm:$0xff]  ;;  %v1579_v61 = vld [vmem:[#allocation8 + $0x70] sm:$0xff] }
  0x70   :  { %3165 = vmatprep.subr.bf16.mxu1 %v3586_v0  ;;  %2919 = vmatprep.mubr.msk.f32.mxu0 %vm3587_vm0, %v3588_v1  ;;  %v1162_v24 = vsub.f32 %v3835_v11, %v1161_v31  ;;  %v688_v36 = vand.u32 4294901760, %v687_v18  ;;  %v3889_v40 = vsub.f32 %v1085_v29, %v1097_v16  ;;  %v3891_v41 = vsub.f32 %v1086_v30, %v1100_v23 }
  0x71   :  { %3204 = vmatprep.subr.bf16.mxu0 %v3586_v0  ;;  %v695_v44 = vand.u32 4294901760, %v694_v37  ;;  %v702_v45 = vand.u32 4294901760, %v701_v39  ;;  %v1172_v46 = vand.u32 4294901760, %v3871_v25  ;;  %v1179_v49 = vand.u32 4294901760, %v3873_v27 }
  0x72   :  { %2843 = vmatmul.mubr.f32.vlgmr.msra.gmra.mrb[2].mxu1 %v3743_v19  ;;  %v1163_v33 = vand.u32 4294901760, %v1162_v24  ;;  %v3241_v42 = vpack.c.bf16 %v3891_v41, %v3889_v40  ;;  %v3196_v43 = vpack.c.bf16 %v688_v36, %v681_v35  ;;  %v1193_v55 = vand.u32 4294901760, %v3891_v41 }
  0x73   :  { %3167 = vmatpush3.bf16.msra.mxu1 %v3166_v52  ;;  %2853 = vmatprep.mubr.msk.f32.mxu1 %vm3587_vm0, %v3588_v1  ;;  %v3250_v53 = vpack.c.bf16 %v1179_v49, %v1172_v46  ;;  %v3199_v54 = vpack.c.bf16 %v702_v45, %v695_v44  ;;  %v1588_v60 = vand.u32 4294901760, %v1578_v57  ;;  %v1591_v3 = vand.u32 4294901760, %v1579_v61 }
  0x74   :  { %3168 = vmatprep.subr.bf16.mxu1 %v3586_v0  ;;  %3206 = vmatpush3.bf16.msra.mxu0 %v3205_v62  ;;  %v1580_v62 = vld [vmem:[#allocation8 + $0x78] sm:$0xff]  ;;  %v1173_v8 = vsub.f32 %v3871_v25, %v1172_v46  ;;  %v1180_v10 = vsub.f32 %v3873_v27, %v1179_v49 }
  0x75   :  { %3213 = vmatprep.subr.bf16.mxu0 %v3586_v0 }
  0x76   :  { %v1174_v29 = vand.u32 4294901760, %v1173_v8  ;;  %v1181_v30 = vand.u32 4294901760, %v1180_v10 }
  0x77   :  { %3170 = vmatpush3.bf16.msra.mxu1 %v3169_v59  ;;  %2920 = vmatmul.mubr.f32.vlgmr.msra.gmra.mrb[2].mxu0 %v3787_v50  ;;  %v1585_v59 = vand.u32 4294901760, %v1577_v56 }
  0x78   :  { %3171 = vmatprep.subr.bf16.mxu1 %v3586_v0  ;;  %3215 = vmatpush3.bf16.msra.mxu0 %v3214_v5  ;;  %v1594_v5 = vand.u32 4294901760, %v1580_v62 }
  0x79   :  { %2941 = vmatprep.mubr.msk.f32.mxu0 %vm3587_vm0, %v3588_v1  ;;  %3216 = vmatprep.subr.bf16.mxu0 %v3586_v0  ;;  %v3922_v2 = vpack.c.bf16 %v1588_v60, %v1585_v59 }
  0x7a   :  { %2854 = vmatmul.mubr.f32.vlgmr.msra.gmra.mrb[4].mxu1 %v3753_v26  ;;  %v3864_v26 = vpack.c.bf16 %v1100_v23, %v1097_v16  ;;  %v3935_v7 = vpack.c.bf16 %v1594_v5, %v1591_v3  ;;  %v1194_v16 = vsub.f32 %v3891_v41, %v1193_v55  ;;  %v1679_v23 = vsub.f32 %v1579_v61, %v1591_v3 }
  0x7b   :  { %3173 = vmatpush3.bf16.msra.mxu1 %v3733_v14  ;;  %2864 = vmatprep.mubr.msk.f32.mxu1 %vm3587_vm0, %v3588_v1  ;;  %v1686_v24 = vsub.f32 %v1580_v62, %v1594_v5 }
  0x7c   :  { %3174 = vmatprep.subr.bf16.mxu1 %v3586_v0  ;;  %3218 = vmatpush3.bf16.msra.mxu0 %v3217_v12  ;;  %v1665_v12 = vsub.f32 %v1577_v56, %v1585_v59  ;;  %v1195_v17 = vand.u32 4294901760, %v1194_v16 }
  0x7d   :  { %3225 = vmatprep.subr.bf16.mxu0 %v3586_v0  ;;  %v3277_v50 = vpack.c.bf16 %v1686_v24, %v1679_v23  ;;  %v1687_v35 = vand.u32 4294901760, %v1686_v24 }
  0x7e   :  { %v1666_v18 = vand.u32 4294901760, %v1665_v12 }
  0x7f   :  { %3176 = vmatpush3.bf16.msra.mxu1 %v3746_v22  ;;  %2942 = vmatmul.mubr.f32.vlgmr.msra.gmra.mrb[4].mxu0 %v3781_v48 }
  0x80   :  { %3177 = vmatprep.subr.bf16.mxu1 %v3586_v0  ;;  %3227 = vmatpush3.bf16.msra.mxu0 %v3847_v32 }
  0x81   :  { %2963 = vmatprep.mubr.msk.f32.mxu0 %vm3587_vm0, %v3588_v1  ;;  %3228 = vmatprep.subr.bf16.mxu0 %v3586_v0 }
  0x82   :  { %2865 = vmatmul.mubr.f32.vlgmr.msra.gmra.mrb[6].mxu1 %v180_v34  ;;  %v3238_v34 = vpack.c.bf16 %v3873_v27, %v3871_v25 }
  0x83   :  { %3179 = vmatpush3.bf16.msra.mxu1 %v3178_v13  ;;  %2875 = vmatprep.mubr.msk.f32.mxu1 %vm3587_vm0, %v3588_v1  ;;  %v1672_v13 = vsub.f32 %v1578_v57, %v1588_v60 }
  0x84   :  { %3180 = vmatprep.subr.bf16.mxu1 %v3586_v0  ;;  %3230 = vmatpush3.bf16.msra.mxu0 %v3864_v26 }
  0x85   :  { %3237 = vmatprep.subr.bf16.mxu0 %v3586_v0  ;;  %v3274_v21 = vpack.c.bf16 %v1672_v13, %v1665_v12  ;;  %v1673_v25 = vand.u32 4294901760, %v1672_v13 }
  0x87   :  { %3182 = vmatpush3.bf16.msra.mxu1 %v3181_v15  ;;  %2964 = vmatmul.mubr.f32.vlgmr.msra.gmra.mrb[6].mxu0 %v1163_v33  ;;  %v3286_v27 = vpack.c.bf16 %v1673_v25, %v1666_v18  ;;  %v1674_v36 = vsub.f32 %v1672_v13, %v1673_v25 }
  0x88   :  { %3183 = vmatprep.subr.bf16.mxu1 %v3586_v0  ;;  %3239 = vmatpush3.bf16.msra.mxu0 %v3238_v34  ;;  %v1680_v34 = vand.u32 4294901760, %v1679_v23 }
  0x89   :  { %2985 = vmatprep.mubr.msk.f32.mxu0 %vm3587_vm0, %v3588_v1  ;;  %3240 = vmatprep.subr.bf16.mxu0 %v3586_v0 }
  0x8a   :  { %2876 = vmatmul.mubr.f32.vlgmr.msra.gmra.mrb[8].mxu1 %v3743_v19  ;;  %v1681_v39 = vsub.f32 %v1679_v23, %v1680_v34 }
  0x8b   :  { %3185 = vmatpush3.bf16.msra.mxu1 %v3733_v14  ;;  %2886 = vmatprep.mubr.msk.f32.mxu1 %vm3587_vm0, %v3588_v1  ;;  %v1582_v14 = vsel %vm105_vm1, %v1576_v38, 0  ;;  %v1675_v38 = vand.u32 4294901760, %v1674_v36 }
  0x8c   :  { %3186 = vmatprep.subr.bf16.mxu1 %v3586_v0  ;;  %v3904_v52 = vand.u32 4294901760, %v1582_v14  ;;  %3242 = vmatpush3.bf16.msra.mxu0 %v3241_v42  ;;  %v1682_v42 = vand.u32 4294901760, %v1681_v39 }
  0x8d   :  { %3249 = vmatprep.subr.bf16.mxu0 %v3586_v0 }
  0x8e   :  { %v3915_v58 = vsub.f32 %v1582_v14, %v3904_v52 }
  0x8f   :  { %3188 = vmatpush3.bf16.msra.mxu1 %v3746_v22  ;;  %v1186_v22 = vand.u32 4294901760, %v3889_v40  ;;  %2986 = vmatmul.mubr.f32.vlgmr.msra.gmra.mrb[8].mxu0 %v3835_v11 }
  0x90   :  { %3195 = vmatprep.subr.bf16.mxu1 %v3586_v0  ;;  %3251 = vmatpush3.bf16.msra.mxu0 %v3250_v53  ;;  %v1655_v63 = vand.u32 4294901760, %v3915_v58 }
  0x91   :  { %3007 = vmatprep.mubr.msk.f32.mxu0 %vm3587_vm0, %v3588_v1  ;;  %3252 = vmatprep.subr.bf16.mxu0 %v3586_v0  ;;  %v1187_v15 = vsub.f32 %v3889_v40, %v1186_v22  ;;  %v1688_v40 = vsub.f32 %v1686_v24, %v1687_v35 }
  0x92   :  { %2887 = vmatmul.mubr.f32.vlgmr.msra.gmra.mrb[10].mxu1 %v3743_v19  ;;  %v3253_v19 = vpack.c.bf16 %v1193_v55, %v1186_v22  ;;  %v1656_v6 = vsub.f32 %v3915_v58, %v1655_v63 }
  0x93   :  { %3197 = vmatpush3.bf16.msra.mxu1 %v3196_v43  ;;  %2908 = vmatprep.mubr.msk.f32.mxu1 %vm3587_vm0, %v3588_v1  ;;  %v1689_v14 = vand.u32 4294901760, %v1688_v40 }
  0x94   :  { %3198 = vmatprep.subr.bf16.mxu1 %v3586_v0  ;;  %3254 = vmatpush3.bf16.msra.mxu0 %v3253_v19  ;;  %v1657_v20 = vand.u32 4294901760, %v1656_v6 }
  0x95   :  { %3261 = vmatprep.subr.bf16.mxu0 %v3586_v0  ;;  %v3271_v11 = vpack.c.bf16 %v1689_v14, %v1682_v42 }
  0x97   :  { %3200 = vmatpush3.bf16.msra.mxu1 %v3199_v54  ;;  %3008 = vmatmul.mubr.f32.vlgmr.msra.gmra.mrb[10].mxu0 %v3823_v4 }
  0x98   :  { %3207 = vmatprep.subr.bf16.mxu1 %v3586_v0  ;;  %3263 = vmatpush3.bf16.msra.mxu0 %v3922_v2 }
  0x99   :  { %3029 = vmatprep.mubr.msk.f32.mxu0 %vm3587_vm0, %v3588_v1  ;;  %3264 = vmatprep.subr.bf16.mxu0 %v3586_v0 }
  0x9a   :  { %2909 = vmatmul.mubr.f32.vlgmr.msra.gmra.mrb[12].mxu1 %v3781_v48 }
  0x9b   :  { %3209 = vmatpush3.bf16.msra.mxu1 %v3756_v28  ;;  %2930 = vmatprep.mubr.msk.f32.mxu1 %vm3587_vm0, %v3588_v1 }
  0x9c   :  { %3210 = vmatprep.subr.bf16.mxu1 %v3586_v0  ;;  %3266 = vmatpush3.bf16.msra.mxu0 %v3935_v7 }
  0x9d   :  { %3273 = vmatprep.subr.bf16.mxu0 %v3586_v0 }
  0x9f   :  { %3212 = vmatpush3.bf16.msra.mxu1 %v3779_v47  ;;  %3030 = vmatmul.mubr.f32.vlgmr.msra.gmra.mrb[12].mxu0 %v1657_v20 }
  0xa0   :  { %3219 = vmatprep.subr.bf16.mxu1 %v3586_v0  ;;  %3275 = vmatpush3.bf16.msra.mxu0 %v3274_v21 }
  0xa1   :  { %3051 = vmatprep.mubr.msk.f32.mxu0 %vm3587_vm0, %v3588_v1  ;;  %3276 = vmatprep.subr.bf16.mxu0 %v3586_v0 }
  0xa2   :  { %2931 = vmatmul.mubr.f32.vlgmr.msra.gmra.mrb[14].mxu1 %v668_v51  ;;  %v3232_v51 = vpack.c.bf16 %v1181_v30, %v1174_v29 }
  0xa3   :  { %3221 = vmatpush3.bf16.msra.mxu1 %v3756_v28  ;;  %2952 = vmatprep.mubr.msk.f32.mxu1 %vm3587_vm0, %v3588_v1  ;;  %v1188_v28 = vand.u32 4294901760, %v1187_v15 }
  0xa4   :  { %3222 = vmatprep.subr.bf16.mxu1 %v3586_v0  ;;  %3278 = vmatpush3.bf16.msra.mxu0 %v3277_v50 }
  0xa5   :  { %3285 = vmatprep.subr.bf16.mxu0 %v3586_v0  ;;  %v3235_v33 = vpack.c.bf16 %v1195_v17, %v1188_v28 }
  0xa7   :  { %3224 = vmatpush3.bf16.msra.mxu1 %v3779_v47  ;;  %3052 = vmatmul.mubr.f32.vlgmr.msra.gmra.mrb[14].mxu0 %v3915_v58  ;;  %v3289_v47 = vpack.c.bf16 %v1687_v35, %v1680_v34 }
  0xa8   :  { %3231 = vmatprep.subr.bf16.mxu1 %v3586_v0  ;;  %3287 = vmatpush3.bf16.msra.mxu0 %v3286_v27 }
  0xa9   :  { %3073 = vmatprep.mubr.msk.f32.mxu0 %vm3587_vm0, %v3588_v1  ;;  %3288 = vmatprep.subr.bf16.mxu0 %v3586_v0 }
  0xaa   :  { %2953 = vmatmul.mubr.f32.vlgmr.msra.gmra.mrb[16].mxu1 %v3781_v48  ;;  %v1667_v48 = vsub.f32 %v1665_v12, %v1666_v18 }
  0xab   :  { %3233 = vmatpush3.bf16.msra.mxu1 %v3232_v51  ;;  %2974 = vmatprep.mubr.msk.f32.mxu1 %vm3587_vm0, %v3588_v1 }
  0xac   :  { %3234 = vmatprep.subr.bf16.mxu1 %v3586_v0  ;;  %3290 = vmatpush3.bf16.msra.mxu0 %v3289_v47  ;;  %v1668_v37 = vand.u32 4294901760, %v1667_v48 }
  0xad   :  { %3297 = vmatprep.subr.bf16.mxu0 %v3586_v0 }
  0xae   :  { %v3268_v41 = vpack.c.bf16 %v1675_v38, %v1668_v37 }
  0xaf   :  { %3236 = vmatpush3.bf16.msra.mxu1 %v3235_v33  ;;  %3074 = vmatmul.mubr.f32.vlgmr.msra.gmra.mrb[16].mxu0 %v3904_v52 }
  0xb0   :  { %3243 = vmatprep.subr.bf16.mxu1 %v3586_v0  ;;  %3095 = vmatprep.mubr.msk.f32.mxu0 %vm3587_vm0, %v3588_v1 }
  0xb2   :  { %2975 = vmatmul.mubr.f32.vlgmr.msra.gmra.mrb[18].mxu1 %v3823_v4 }
  0xb3   :  { %3245 = vmatpush3.bf16.msra.mxu1 %v3847_v32  ;;  %2996 = vmatprep.mubr.msk.f32.mxu1 %vm3587_vm0, %v3588_v1 }
  0xb4   :  { %3246 = vmatprep.subr.bf16.mxu1 %v3586_v0 }
  0xb7   :  { %3248 = vmatpush3.bf16.msra.mxu1 %v3864_v26 }
  0xb8   :  { %3255 = vmatprep.subr.bf16.mxu1 %v3586_v0 }
  0xba   :  { %2997 = vmatmul.mubr.f32.vlgmr.msra.gmra.mrb[20].mxu1 %v1161_v31 }
  0xbb   :  { %3257 = vmatpush3.bf16.msra.mxu1 %v3847_v32  ;;  %3018 = vmatprep.mubr.msk.f32.mxu1 %vm3587_vm0, %v3588_v1 }
  0xbc   :  { %3258 = vmatprep.subr.bf16.mxu1 %v3586_v0 }
  0xbf   :  { %3260 = vmatpush3.bf16.msra.mxu1 %v3864_v26 }
  0xc0   :  { %3267 = vmatprep.subr.bf16.mxu1 %v3586_v0 }
  0xc2   :  { %3019 = vmatmul.mubr.f32.vlgmr.msra.gmra.mrb[22].mxu1 %v3823_v4 }
  0xc3   :  { %3269 = vmatpush3.bf16.msra.mxu1 %v3268_v41  ;;  %3040 = vmatprep.mubr.msk.f32.mxu1 %vm3587_vm0, %v3588_v1 }
  0xc4   :  { %3270 = vmatprep.subr.bf16.mxu1 %v3586_v0 }
  0xc7   :  { %3272 = vmatpush3.bf16.msra.mxu1 %v3271_v11 }
  0xc8   :  { %3279 = vmatprep.subr.bf16.mxu1 %v3586_v0 }
  0xca   :  { %3041 = vmatmul.mubr.f32.vlgmr.msra.gmra.mrb[24].mxu1 %v3904_v52 }
  0xcb   :  { %3281 = vmatpush3.bf16.msra.mxu1 %v3922_v2  ;;  %3062 = vmatprep.mubr.msk.f32.mxu1 %vm3587_vm0, %v3588_v1 }
  0xcc   :  { %3282 = vmatprep.subr.bf16.mxu1 %v3586_v0 }
  0xcf   :  { %3284 = vmatpush3.bf16.msra.mxu1 %v3935_v7 }
  0xd0   :  { %3291 = vmatprep.subr.bf16.mxu1 %v3586_v0 }
  0xd2   :  { %3063 = vmatmul.mubr.f32.vlgmr.msra.gmra.mrb[26].mxu1 %v1655_v63 }
  0xd3   :  { %3293 = vmatpush3.bf16.msra.mxu1 %v3922_v2  ;;  %3084 = vmatprep.mubr.msk.f32.mxu1 %vm3587_vm0, %v3588_v1 }
  0xd4   :  { %3294 = vmatprep.subr.bf16.mxu1 %v3586_v0 }
  0xd7   :  { %3296 = vmatpush3.bf16.msra.mxu1 %v3935_v7 }
  0xda   :  { %3085 = vmatmul.mubr.f32.vlgmr.msra.gmra.mrb[28].mxu1 %v3904_v52 }
 0x13d   :  { %v184_v4 = vpop.f32.mrb[0].mxu1 }
 0x13e   :  { %v2833_v31 = vpop.f32.mrb[1].mxu1 }
 0x141   :  { %v672_v44 = vpop.f32.mrb[0].mxu0 }
 0x142   :  { %v2899_v45 = vpop.f32.mrb[1].mxu0 }
 0x145   :  { %v275_v32 = vpop.f32.mrb[2].mxu1 }
 0x146   :  { %v276_v26 = vadd.f32 %v275_v32, %v184_v4  ;;  %v2844_v43 = vpop.f32.mrb[3].mxu1 }
 0x14a   :  { %v843_v54 = vpop.f32.mrb[2].mxu0 }
 0x14b   :  { %v2921_v22 = vpop.f32.mrb[3].mxu0 }
 0x14d   :  { %v355_v46 = vpop.f32.mrb[4].mxu1 }
 0x14e   :  { %v356_v49 = vadd.f32 %v355_v46, %v276_v26  ;;  %v2855_v53 = vpop.f32.mrb[5].mxu1 }
 0x14f   :  { %v2670_v53 = vld [vmem:[%s4110_s5] ss:$0 sm:$0xff]  ;;  %s3589_s5 = smov 96  }
 0x152   :  { %v1003_v58 = vpop.f32.mrb[4].mxu0 }
 0x153   :  { %v2943_v19 = vpop.f32.mrb[5].mxu0 }
 0x155   :  { %v432_v55 = vpop.f32.mrb[6].mxu1 }
 0x156   :  { %v433_v56 = vadd.f32 %v432_v55, %v356_v49  ;;  %v2866_v57 = vpop.f32.mrb[7].mxu1 }
 0x157   :  { %v2094_v57 = vld [vmem:[#allocation10 + $0x8] sm:$0xff] }
 0x158   :  { %v2104_v19 = vand.u32 4294901760, %v2094_v57 }
 0x15a   :  { %v1165_v61 = vpop.f32.mrb[6].mxu0 }
 0x15b   :  { %v2965_v62 = vpop.f32.mrb[7].mxu0 }
 0x15c   :  { %v2096_v62 = vld [vmem:[#allocation10 + $0x18] sm:$0xff] }
 0x15d   :  { %v515_v59 = vpop.f32.mrb[8].mxu1 }
 0x15e   :  { %v516_v60 = vadd.f32 %v515_v59, %v433_v56  ;;  %v2877_v52 = vpop.f32.mrb[9].mxu1  ;;  %v2093_v56 = vld [vmem:[#allocation10] sm:$0xff] }
 0x15f   :  { %v2188_v52 = vsub.f32 %v2094_v57, %v2104_v19 }
 0x162   :  { %v1336_v5 = vpop.f32.mrb[8].mxu0 }
 0x163   :  { %v2987_v7 = vpop.f32.mrb[9].mxu0 }
 0x165   :  { %v590_v63 = vpop.f32.mrb[10].mxu1 }
 0x166   :  { %v591_v2 = vadd.f32 %v590_v63, %v516_v60  ;;  %v2888_v3 = vpop.f32.mrb[11].mxu1 }
 0x168   :  { %v673_v6 = vadd.f32 %v672_v44, %v591_v2  ;;  %v2110_v2 = vand.u32 4294901760, %v2096_v62 }
 0x16a   :  { %v1496_v13 = vpop.f32.mrb[10].mxu0 }
 0x16b   :  { %v3009_v21 = vpop.f32.mrb[11].mxu0 }
 0x16d   :  { %v763_v8 = vpop.f32.mrb[12].mxu1 }
 0x16e   :  { %v764_v10 = vadd.f32 %v763_v8, %v673_v6  ;;  %v2910_v12 = vpop.f32.mrb[13].mxu1  ;;  %v2202_v8 = vsub.f32 %v2096_v62, %v2110_v2 }
 0x170   :  { %v844_v20 = vadd.f32 %v843_v54, %v764_v10 }
 0x172   :  { %v1659_v16 = vpop.f32.mrb[12].mxu0 }
 0x173   :  { %v3031_v24 = vpop.f32.mrb[13].mxu0 }
 0x175   :  { %v920_v29 = vpop.f32.mrb[14].mxu1 }
 0x176   :  { %v921_v30 = vadd.f32 %v920_v29, %v844_v20  ;;  %v2932_v15 = vpop.f32.mrb[15].mxu1  ;;  %v2203_v29 = vand.u32 4294901760, %v2202_v8 }
 0x178   :  { %v1004_v23 = vadd.f32 %v1003_v58, %v921_v30  ;;  %v2101_v58 = vand.u32 4294901760, %v2093_v56 }
 0x17a   :  { %v1830_v17 = vpop.f32.mrb[14].mxu0  ;;  %v4015_v59 = vpack.c.bf16 %v2104_v19, %v2101_v58  ;;  %v2181_v60 = vsub.f32 %v2093_v56, %v2101_v58 }
 0x17b   :  { %v3053_v18 = vpop.f32.mrb[15].mxu0 }
 0x17c   :  { %3299 = vmatpush3.bf16.msra.mxu0 %v4015_v59  ;;  %v2182_v3 = vand.u32 4294901760, %v2181_v60  ;;  %v3310_v18 = vpack.c.bf16 %v2188_v52, %v2181_v60 }
 0x17d   :  { %v1078_v50 = vpop.f32.mrb[16].mxu1  ;;  %3300 = vmatprep.subr.bf16.mxu0 %v3586_v0 }
 0x17e   :  { %v1079_v51 = vadd.f32 %v1078_v50, %v1004_v23  ;;  %v2954_v28 = vpop.f32.mrb[17].mxu1  ;;  %v2183_v10 = vsub.f32 %v2181_v60, %v2182_v3  ;;  %v2204_v23 = vsub.f32 %v2202_v8, %v2203_v29 }
 0x180   :  { %v2184_v20 = vand.u32 4294901760, %v2183_v10  ;;  %v2205_v28 = vand.u32 4294901760, %v2204_v23 }
 0x182   :  { %v1990_v34 = vpop.f32.mrb[16].mxu0 }
 0x183   :  { %v3075_v47 = vpop.f32.mrb[17].mxu0 }
 0x185   :  { %v1256_v25 = vpop.f32.mrb[18].mxu1 }
 0x186   :  { %v1257_v27 = vadd.f32 %v1256_v25, %v1165_v61  ;;  %v2976_v33 = vpop.f32.mrb[19].mxu1  ;;  %v2095_v61 = vld [vmem:[#allocation10 + $0x10] sm:$0xff] }
 0x187   :  { %v2107_v63 = vand.u32 4294901760, %v2095_v61 }
 0x188   :  { %v1337_v35 = vadd.f32 %v1336_v5, %v1257_v27  ;;  %v2189_v5 = vand.u32 4294901760, %v2188_v52 }
 0x189   :  { %v4019_v6 = vpack.c.bf16 %v2110_v2, %v2107_v63  ;;  %v2195_v7 = vsub.f32 %v2095_v61, %v2107_v63 }
 0x18a   :  { %v2190_v12 = vsub.f32 %v2188_v52, %v2189_v5  ;;  %v3322_v33 = vpack.c.bf16 %v2189_v5, %v2182_v3 }
 0x18b   :  { %3302 = vmatpush3.bf16.msra.mxu0 %v4019_v6  ;;  %v2196_v21 = vand.u32 4294901760, %v2195_v7  ;;  %v3313_v25 = vpack.c.bf16 %v2202_v8, %v2195_v7 }
 0x18c   :  { %3303 = vmatprep.subr.bf16.mxu0 %v3586_v0  ;;  %v2191_v30 = vand.u32 4294901760, %v2190_v12 }
 0x18d   :  { %v1413_v48 = vpop.f32.mrb[20].mxu1 }
 0x18e   :  { %v1414_v36 = vadd.f32 %v1413_v48, %v1337_v35  ;;  %v2998_v37 = vpop.f32.mrb[21].mxu1  ;;  %v3304_v50 = vpack.c.bf16 %v2191_v30, %v2184_v20 }
 0x190   :  { %v1497_v38 = vadd.f32 %v1496_v13, %v1414_v36 }
 0x195   :  { %v1571_v39 = vpop.f32.mrb[22].mxu1 }
 0x196   :  { %v1572_v40 = vadd.f32 %v1571_v39, %v1497_v38  ;;  %v3020_v41 = vpop.f32.mrb[23].mxu1 }
 0x198   :  { %v1575_v42 = vadd.f32 %v1572_v40, %v1079_v51 }
 0x19d   :  { %v1750_v14 = vpop.f32.mrb[24].mxu1 }
 0x19e   :  { %v1751_v11 = vadd.f32 %v1750_v14, %v1659_v16  ;;  %v3042_v4 = vpop.f32.mrb[25].mxu1  ;;  %v2197_v16 = vsub.f32 %v2195_v7, %v2196_v21 }
 0x1a0   :  { %v1831_v31 = vadd.f32 %v1830_v17, %v1751_v11  ;;  %v2198_v51 = vand.u32 4294901760, %v2197_v16 }
 0x1a2   :  { %v3307_v17 = vpack.c.bf16 %v2205_v28, %v2198_v51 }
 0x1a5   :  { %v1907_v32 = vpop.f32.mrb[26].mxu1 }
 0x1a6   :  { %v1908_v26 = vadd.f32 %v1907_v32, %v1831_v31  ;;  %v3064_v43 = vpop.f32.mrb[27].mxu1 }
 0x1a8   :  { %v1991_v44 = vadd.f32 %v1990_v34, %v1908_v26  ;;  %v3325_v34 = vpack.c.bf16 %v2203_v29, %v2196_v21 }
 0x1ad   :  { %v2065_v45 = vpop.f32.mrb[28].mxu1 }
 0x1ae   :  { %v2066_v46 = vadd.f32 %v2065_v45, %v1991_v44  ;;  %v3086_v49 = vpop.f32.mrb[29].mxu1 }
 0x1b0   :  { %v2069_v54 = vadd.f32 %v2066_v46, %v1575_v42 }
 0x1b2   :  { %v4011_v22 = vadd.f32 %v2670_v53, %v2069_v54 }
 0x1b4   :  { %v2671_v55 = vmul.f32 -1.442695, %v4011_v22  ;;  %3359 = vtanh.f32 %v4011_v22 }
 0x1b6   :  { %3361 = vpow2.f32 %v2671_v55 }
 0x1be   :  { %v3360_v13 = vpop.eup %3359 }
 0x1bf   :  { %2088 = vrot.lane.b32.xlu0 %v3360_v13, %s3589_s5 }
 0x1c0   :  { %v3362_v15 = vpop.eup %3361 }
 0x1c1   :  { %v2081_v24 = vadd.f32 1.0, %v3362_v15 }
 0x1c3   :  { %3363 = vrcp.f32 %v2081_v24 }
 0x1cd   :  { %v3364_v27 = vpop.eup %3363 }
 0x1ce   :  { %2597 = vst.msk [vmem:[#allocation12] sm:$0xff] %vm105_vm1, %v3364_v27  ;;  %v2085_v35 = vsub.f32 1.0, %v3364_v27 }
 0x1d0   :  { %v2086_v48 = vmul.f32 %v2085_v35, %v3729_v9 }
 0x231   :  { %v2089_v47 = vpop.permute.xlu0 %2088 }
 0x232   :  { %v2091_v36 = vmul.f32 %v3364_v27, %v2089_v47 }
 0x234   :  { %v2092_v37 = vadd.f32 %v2091_v36, %v2086_v48 }
 0x236   :  { %v2098_v38 = vsel %vm105_vm1, %v2092_v37, 0  ;;  %2596 = vst.msk [vmem:[#allocation11] sm:$0xff] %vm105_vm1, %v2092_v37  ;;  %2603 = vrot.lane.b32.xlu1 %v2092_v37, %s3590_s11 }
 0x237   :  { %v2169_v39 = vand.u32 4294901760, %v2098_v38 }
 0x239   :  { %v2170_v40 = vsub.f32 %v2098_v38, %v2169_v39 }
 0x23b   :  { %v2171_v41 = vand.u32 4294901760, %v2170_v40 }
 0x23d   :  { %v2172_v42 = vsub.f32 %v2170_v40, %v2171_v41 }
 0x23f   :  { %v2173_v14 = vand.u32 4294901760, %v2172_v42 }
 0x241   :  { %3096 = vmatmul.mubr.f32.vlgmr.msra.gmra.mrb[18].mxu0 %v2173_v14 }
 0x242   :  { %3305 = vmatpush3.bf16.msra.mxu0 %v3304_v50  ;;  %3106 = vmatprep.mubr.msk.f32.mxu0 %vm3587_vm0, %v3588_v1 }
 0x243   :  { %3306 = vmatprep.subr.bf16.mxu0 %v3586_v0 }
 0x246   :  { %3308 = vmatpush3.bf16.msra.mxu0 %v3307_v17 }
 0x247   :  { %3309 = vmatprep.subr.bf16.mxu0 %v3586_v0 }
 0x249   :  { %3107 = vmatmul.mubr.f32.vlgmr.msra.gmra.mrb[18].mxu0 %v2169_v39 }
 0x24a   :  { %3311 = vmatpush3.bf16.msra.mxu0 %v3310_v18  ;;  %3117 = vmatprep.mubr.msk.f32.mxu0 %vm3587_vm0, %v3588_v1 }
 0x24b   :  { %3312 = vmatprep.subr.bf16.mxu0 %v3586_v0 }
 0x24e   :  { %3314 = vmatpush3.bf16.msra.mxu0 %v3313_v25 }
 0x24f   :  { %3315 = vmatprep.subr.bf16.mxu0 %v3586_v0 }
 0x251   :  { %3118 = vmatmul.mubr.f32.vlgmr.msra.gmra.mrb[18].mxu0 %v2170_v40 }
 0x252   :  { %3317 = vmatpush3.bf16.msra.mxu0 %v4015_v59  ;;  %3128 = vmatprep.mubr.msk.f32.mxu0 %vm3587_vm0, %v3588_v1 }
 0x253   :  { %3318 = vmatprep.subr.bf16.mxu0 %v3586_v0 }
 0x256   :  { %3320 = vmatpush3.bf16.msra.mxu0 %v4019_v6 }
 0x257   :  { %3321 = vmatprep.subr.bf16.mxu0 %v3586_v0 }
 0x259   :  { %3129 = vmatmul.mubr.f32.vlgmr.msra.gmra.mrb[18].mxu0 %v2171_v41 }
 0x25a   :  { %3323 = vmatpush3.bf16.msra.mxu0 %v3322_v33  ;;  %3139 = vmatprep.mubr.msk.f32.mxu0 %vm3587_vm0, %v3588_v1 }
 0x25b   :  { %3324 = vmatprep.subr.bf16.mxu0 %v3586_v0 }
 0x25e   :  { %3326 = vmatpush3.bf16.msra.mxu0 %v3325_v34 }
 0x25f   :  { %3327 = vmatprep.subr.bf16.mxu0 %v3586_v0 }
 0x261   :  { %3140 = vmatmul.mubr.f32.vlgmr.msra.gmra.mrb[18].mxu0 %v2169_v39 }
 0x262   :  { %3329 = vmatpush3.bf16.msra.mxu0 %v4015_v59  ;;  %3150 = vmatprep.mubr.msk.f32.mxu0 %vm3587_vm0, %v3588_v1 }
 0x263   :  { %3330 = vmatprep.subr.bf16.mxu0 %v3586_v0 }
 0x266   :  { %3332 = vmatpush3.bf16.msra.mxu0 %v4019_v6 }
 0x269   :  { %3151 = vmatmul.mubr.f32.vlgmr.msra.gmra.mrb[18].mxu0 %v2169_v39 }
 0x33c   :  { %v2581_v9 = vpop.f32.mrb[18].mxu0 }
 0x33d   :  { %2586 = vrot.lane.b32.xlu0 %v2581_v9, %s3590_s11  ;;  %v3152_v11 = vpop.f32.mrb[19].mxu0 }
 0x3af   :  { %v2587_v4 = vpop.permute.xlu0 %2586 }
 0x3b0   :  { %v2589_v31 = vadd.f32 %v2587_v4, %v4011_v22 }
 0x3b2   :  { %v2672_v32 = vmul.f32 -1.442695, %v2589_v31 }
 0x3b4   :  { %3365 = vpow2.f32 %v2672_v32 }
 0x3be   :  { %v3366_v26 = vpop.eup %3365 }
 0x3bf   :  { %v2593_v43 = vadd.f32 1.0, %v3366_v26 }
 0x3c1   :  { %3367 = vrcp.f32 %v2593_v43 }
 0x3c2   :  { %3490 = shalt.err (!%p3487_p2)
}
 0x3c3   :  { %s3491_s0 = scalar_lea.hbm %s4113_s8, 128 }
 0x3c4   :  { %p3492_p3 = scmp.ne.s32.totalorder %s4113_s8, %s3491_s0  ;;  %p3495_p4 = scmp.lt.u32.totalorder %s3491_s0, %s4113_s8 }
 0x3c6   :  { %p3497_p5 = pnand %p3495_p4, %p3492_p3 }
 0x3c8   :  { %3500 = shalt.err (!%p3497_p5)
}
 0x3c9   :  { %2631 = dma.vmem_to_hbm [thread:$0]  %s2629_s13, 128, %s4113_s8, [#allocation13]  }
 0x3ca   :  { %s3501_s28 = scalar_lea.vmem %s2619_s17, 128  ;;  %p3506_p7 = scmp.lt.s32.totalorder %s2619_s17, %s2619_s17 }
 0x3cb   :  { %p3502_p6 = scmp.ne.s32.totalorder %s2619_s17, %s3501_s28  ;;  %p3507_p8 = scmp.lt.s32.totalorder %s3501_s28, %s3501_s28 }
 0x3cd   :  { %p3508_p9 = por %p3507_p8, %p3506_p7 }
 0x3cf   :  { %p3509_p10 = pnand %p3508_p9, %p3502_p6 }
 0x3d1   :  { %3512 = shalt.err (!%p3509_p10)
}
 0x3d2   :  { %s3513_s16 = scalar_lea.hbm %s4112_s7, 128 }
 0x3d3   :  { %p3514_p11 = scmp.ne.s32.totalorder %s4112_s7, %s3513_s16  ;;  %p3517_p12 = scmp.lt.u32.totalorder %s3513_s16, %s4112_s7 }
 0x3d5   :  { %p3519_p13 = pnand %p3517_p12, %p3514_p11 }
 0x3d7   :  { %3522 = shalt.err (!%p3519_p13)
}
 0x3d8   :  { %2621 = dma.vmem_to_hbm [thread:$0]  %s2619_s17, 128, %s4112_s7, [#allocation4]   ;;  %v3368_v0 = vpop.eup %3367  ;;  %v2604_v1 = vpop.permute.xlu1 %2603 }
 0x3d9   :  { %2599 = vrot.lane.b32.xlu1 %v3368_v0, %s3590_s11  ;;  %v2606_v44 = vmul.f32 %v3368_v0, %v2604_v1  ;;  %s3593_s3 = smov [#allocation14]   ;;  %s3594_s5 = smov [#allocation15]  }
 0x3da   :  { %s2638_s14 = sshll.u32 %s3593_s3, 4  ;;  %s2648_s12 = sshll.u32 %s3594_s5, 4  ;;  %s2639_s14 = int_to_ptr.vmem [resolvable:$true] %s2638_s14  ;;  %s2649_s12 = int_to_ptr.vmem [resolvable:$true] %s2648_s12 }
 0x3db   :  { %2608 = vrot.lane.b32.xlu0 %v2606_v44, %s3590_s11  ;;  %s3523_s13 = scalar_lea.vmem %s2639_s14, 128  ;;  %p3528_p1 = scmp.lt.s32.totalorder %s2639_s14, %s2639_s14 }
 0x3dc   :  { %p3524_p0 = scmp.ne.s32.totalorder %s2639_s14, %s3523_s13  ;;  %p3529_p2 = scmp.lt.s32.totalorder %s3523_s13, %s3523_s13 }
 0x3de   :  { %p3530_p3 = por %p3529_p2, %p3528_p1 }
 0x3e0   :  { %p3531_p4 = pnand %p3530_p3, %p3524_p0 }
 0x44b   :  { %v2600_v45 = vpop.permute.xlu1 %2599 }
 0x44c   :  { %2602 = vst.msk [vmem:[#allocation14] sm:$0xff] %vm105_vm1, %v2600_v45 }
 0x44d   :  { %v2609_v46 = vpop.permute.xlu0 %2608 }
 0x44e   :  { %3534 = shalt.err (!%p3531_p4)
}
 0x44f   :  { %s3535_s11 = scalar_lea.hbm %s4114_s9, 128 }
 0x450   :  { %p3536_p5 = scmp.ne.s32.totalorder %s4114_s9, %s3535_s11  ;;  %p3539_p6 = scmp.lt.u32.totalorder %s3535_s11, %s4114_s9 }
 0x452   :  { %p3541_p7 = pnand %p3539_p6, %p3536_p5 }
 0x454   :  { %3544 = shalt.err (!%p3541_p7)
}
 0x455   :  { %2641 = dma.vmem_to_hbm [thread:$0]  %s2639_s14, 128, %s4114_s9, [#allocation13]   ;;  %2611 = vst.msk [vmem:[#allocation15] sm:$0xff] %vm105_vm1, %v2609_v46 }
 0x456   :  { %s3545_s23 = scalar_lea.vmem %s2649_s12, 128  ;;  %p3550_p9 = scmp.lt.s32.totalorder %s2649_s12, %s2649_s12 }
 0x457   :  { %p3546_p8 = scmp.ne.s32.totalorder %s2649_s12, %s3545_s23  ;;  %p3551_p10 = scmp.lt.s32.totalorder %s3545_s23, %s3545_s23 }
 0x459   :  { %p3552_p11 = por %p3551_p10, %p3550_p9 }
 0x45b   :  { %p3553_p12 = pnand %p3552_p11, %p3546_p8 }
 0x45d   :  { %3556 = shalt.err (!%p3553_p12)
}
 0x45e   :  { %s3557_s26 = scalar_lea.hbm %s4115_s10, 128 }
 0x45f   :  { %p3558_p13 = scmp.ne.s32.totalorder %s4115_s10, %s3557_s26  ;;  %p3561_p0 = scmp.lt.u32.totalorder %s3557_s26, %s4115_s10 }
 0x461   :  { %p3563_p1 = pnand %p3561_p0, %p3558_p13 }
 0x463   :  { %3566 = shalt.err (!%p3563_p1)
}
 0x464   :  { %2651 = dma.vmem_to_hbm [thread:$0]  %s2649_s12, 128, %s4115_s10, [#allocation16]  }
 0x465   :  { %3573 = dma.done.wait [#allocation4], 128  }
 0x466   :  { %3574 = vsyncadd [#allocation4], 4294967168 }
 0x467   :  { %3575 = dma.done.wait [#allocation13], 256  }
 0x468   :  { %3576 = vsyncadd [#allocation13], 4294967040 }
 0x469   :  { %3577 = dma.done.wait [#allocation16], 128  }
 0x46a   :  { %3578 = vsyncadd [#allocation16], 4294967168 }
 0x46b   :  { %2664 = vsyncpa [#allocation3], 1 }
 0x46c   :  { %2665 = vsyncpa [#allocation6], 1 }
 0x46d   :  { %2666 = vsyncpa [#allocation9], 1 }
 0x46e   :  { %2667 = vsyncpa [#allocation4], 1 }
 0x46f   :  { %2668 = vsyncpa [#allocation13], 1 }
 0x470   :  { %2669 = vsyncpa [#allocation16], 1 }

</bundles_post_ra>
